<compile_context>
chip_gen: v5e
topology: v5e:2x2
jax: 0.10.0
libtpu: 0.0.40
codegen_flags: <defaults>
</compile_context>

<pallas_src>
import functools

import jax
import jax.numpy as jnp
from jax.experimental import pallas as pl
from jax.experimental.pallas import tpu as pltpu


# ----------------------------------------------------------------------------
# Stage 1: combined weight  W_combined = W_orig + scale * (W1a@W1b) * (W2a@W2b)
# ----------------------------------------------------------------------------
def _combined_weight_kernel(scale, w_ref, w1a_ref, w1b_ref, w2a_ref, w2b_ref, o_ref):
    # Rank-K factor matmuls on the MXU with f32 accumulation.
    w1 = jnp.dot(w1a_ref[...], w1b_ref[...], preferred_element_type=jnp.float32)
    w2 = jnp.dot(w2a_ref[...], w2b_ref[...], preferred_element_type=jnp.float32)
    o_ref[...] = (w_ref[...].astype(jnp.float32) + scale * (w1 * w2)).astype(o_ref.dtype)


# ----------------------------------------------------------------------------
# Stage 2: y = x @ W_combined.T + bias, tiled (M, N, K) with f32 accumulator.
# ----------------------------------------------------------------------------
def _matmul_bias_kernel(x_ref, w_ref, b_ref, o_ref, acc_ref):
    k = pl.program_id(2)

    @pl.when(k == 0)
    def _():
        acc_ref[...] = jnp.zeros_like(acc_ref)

    # Contract x [TM, TK] with W [TN, TK] along the `in` axis — no transpose.
    acc_ref[...] += jax.lax.dot_general(
        x_ref[...], w_ref[...],
        dimension_numbers=(((1,), (1,)), ((), ())),
        preferred_element_type=jnp.float32)

    @pl.when(k == pl.num_programs(2) - 1)
    def _():
        # Bias added exactly once, in the finalize step.
        o_ref[...] = (acc_ref[...] + b_ref[...].astype(jnp.float32)).astype(o_ref.dtype)


def _largest_tile(dim, target, align):
    """Largest `align`-multiple tile <= target that evenly divides dim; else full dim."""
    if dim <= target:
        return dim
    t = (target // align) * align
    while t >= align:
        if dim % t == 0:
            return t
        t -= align
    return dim


def loha_linear_forward(x, w_orig, b_orig, w1_a, w1_b, w2_a, w2_b,
                        alpha, rank, *, tm=256, tn=256, tk=512):
    """x: [..., in_features] -> [..., out_features] (LoHa-adapted Linear)."""
    out_features, in_features = w_orig.shape
    lead_shape = x.shape[:-1]
    x2d = x.reshape(-1, in_features)
    n_rows = x2d.shape[0]
    scale = float(alpha) / float(rank)
    compute_dtype = x.dtype

    # Tile sizes respecting the (8, 128) layout constraints.
    TM = _largest_tile(n_rows, tm, 8)          # second-to-last dim of x / out tiles
    TN = _largest_tile(out_features, tn, 128)  # last dim of out/bias tiles -> lane-dense
    TK = _largest_tile(in_features, tk, 128)   # last dim of x / W tiles

    # ---- Stage 1: build W_combined once, tiled over (out, in). -------------
    w_combined = pl.pallas_call(
        functools.partial(_combined_weight_kernel, scale),
        out_shape=jax.ShapeDtypeStruct((out_features, in_features), compute_dtype),
        grid_spec=pltpu.PrefetchScalarGridSpec(
            num_scalar_prefetch=0,
            grid=(out_features // TN, in_features // TK),
            in_specs=[
                pl.BlockSpec((TN, TK), lambda j, k: (j, k)),      # W_orig
                pl.BlockSpec((TN, rank), lambda j, k: (j, 0)),    # hada_w1_a
                pl.BlockSpec((rank, TK), lambda j, k: (0, k)),    # hada_w1_b
                pl.BlockSpec((TN, rank), lambda j, k: (j, 0)),    # hada_w2_a
                pl.BlockSpec((rank, TK), lambda j, k: (0, k)),    # hada_w2_b
            ],
            out_specs=pl.BlockSpec((TN, TK), lambda j, k: (j, k)),
        ),
        compiler_params=pltpu.CompilerParams(
            dimension_semantics=("parallel", "parallel"),
            vmem_limit_bytes=64 * 1024 * 1024),
    )(w_orig, w1_a, w1_b, w2_a, w2_b)

    # ---- Stage 2: single fused matmul over the combined weight. ------------
    bias_2d = b_orig.reshape(1, out_features)
    out = pl.pallas_call(
        _matmul_bias_kernel,
        out_shape=jax.ShapeDtypeStruct((n_rows, out_features), x.dtype),
        grid_spec=pltpu.PrefetchScalarGridSpec(
            num_scalar_prefetch=0,
            grid=(n_rows // TM, out_features // TN, in_features // TK),
            in_specs=[
                pl.BlockSpec((TM, TK), lambda i, j, k: (i, k)),   # x
                pl.BlockSpec((TN, TK), lambda i, j, k: (j, k)),   # W_combined
                pl.BlockSpec((1, TN), lambda i, j, k: (0, j)),    # bias
            ],
            out_specs=pl.BlockSpec((TM, TN), lambda i, j, k: (i, j)),
            scratch_shapes=[pltpu.VMEM((TM, TN), jnp.float32)],
        ),
        compiler_params=pltpu.CompilerParams(
            dimension_semantics=("parallel", "parallel", "arbitrary"),
            vmem_limit_bytes=64 * 1024 * 1024),
    )(x2d, w_combined, bias_2d)

    return out.reshape(*lead_shape, out_features)


def loha_linear_reference(x, w_orig, b_orig, w1_a, w1_b, w2_a, w2_b, alpha, rank):
    """Pure-JAX reference mirroring LoHaModule.forward semantics."""
    w1 = w1_a @ w1_b
    w2 = w2_a @ w2_b
    w = w1 * w2 * (alpha / rank)
    return x @ w_orig.T + b_orig + x @ w.T


if __name__ == "__main__":
    # Small shapes implied by the module: Linear(in=32, out=32), rank=8.
    batch, seq = 2, 8
    in_features, out_features = 32, 32
    rank = 8
    alpha = 4.0

    key = jax.random.PRNGKey(0)
    k_x, k_w, k_b, k_w1a, k_w1b, k_w2a, k_w2b = jax.random.split(key, 7)

    x = jax.random.normal(k_x, (batch, seq, in_features), dtype=jnp.float32)

    # Original Linear parameters (deterministic synthetic init).
    bound = 1.0 / (in_features ** 0.5)
    w_orig = jax.random.uniform(k_w, (out_features, in_features),
                                minval=-bound, maxval=bound, dtype=jnp.float32)
    b_orig = jax.random.uniform(k_b, (out_features,),
                                minval=-bound, maxval=bound, dtype=jnp.float32)

    # LoHa parameters. initialize_weights() would set hada_w2_a = 0 (delta = 0);
    # use a small nonzero w2_a here so the Hadamard path is actually exercised.
    hada_w1_a = 0.1 * jax.random.normal(k_w1a, (out_features, rank), dtype=jnp.float32)
    hada_w1_b = jax.random.normal(k_w1b, (rank, in_features), dtype=jnp.float32)
    hada_w2_a = 0.1 * jax.random.normal(k_w2a, (out_features, rank), dtype=jnp.float32)
    hada_w2_b = jax.random.normal(k_w2b, (rank, in_features), dtype=jnp.float32)

    y = loha_linear_forward(x, w_orig, b_orig,
                            hada_w1_a, hada_w1_b, hada_w2_a, hada_w2_b,
                            alpha, rank)
    y = jax.block_until_ready(y)

    y_ref = loha_linear_reference(x, w_orig, b_orig,
                                  hada_w1_a, hada_w1_b, hada_w2_a, hada_w2_b,
                                  alpha, rank)

    assert y.shape == (batch, seq, out_features)
    assert jnp.allclose(y, y_ref, atol=1e-4, rtol=1e-4), "mismatch vs reference"

    print("KERNEL_OK")
</pallas_src>

<mosaic_0001>
module attributes {stable_mosaic.version = 11 : i64} {
  func.func @_combined_weight_kernel(%arg0: i32, %arg1: i32, %arg2: memref<32x32xf32, #tpu.memory_space<vmem>>, %arg3: memref<32x8xf32, #tpu.memory_space<vmem>>, %arg4: memref<8x32xf32, #tpu.memory_space<vmem>>, %arg5: memref<32x8xf32, #tpu.memory_space<vmem>>, %arg6: memref<8x32xf32, #tpu.memory_space<vmem>>, %arg7: memref<32x32xf32, #tpu.memory_space<vmem>>) attributes {dimension_semantics = [#tpu.dimension_semantics<parallel>, #tpu.dimension_semantics<parallel>], iteration_bounds = array<i64: 1, 1>, scalar_prefetch = 0 : i64, scratch_operands = 0 : i64, tpu.core_type = #tpu.core_type<tc>, window_params = [{transform_indices = @transform_0, window_bounds = array<i64: 32, 32>}, {transform_indices = @transform_1, window_bounds = array<i64: 32, 8>}, {transform_indices = @transform_2, window_bounds = array<i64: 8, 32>}, {transform_indices = @transform_3, window_bounds = array<i64: 32, 8>}, {transform_indices = @transform_4, window_bounds = array<i64: 8, 32>}, {transform_indices = @transform_5, window_bounds = array<i64: 32, 32>}]} {
    %c0 = arith.constant 0 : index
    %c0_0 = arith.constant 0 : index
    %0 = vector.load %arg3[%c0, %c0_0] : memref<32x8xf32, #tpu.memory_space<vmem>>, vector<32x8xf32>
    %c0_1 = arith.constant 0 : index
    %c0_2 = arith.constant 0 : index
    %1 = vector.load %arg4[%c0_1, %c0_2] : memref<8x32xf32, #tpu.memory_space<vmem>>, vector<8x32xf32>
    %cst = arith.constant dense<0.000000e+00> : vector<32x32xf32>
    %2 = tpu.matmul %0, %1, %cst {dimension_numbers = #tpu.dot_dimension_numbers<[1], [0], [0], [1], [0, 0, 1, 1], [], []>} : vector<32x8xf32>, vector<8x32xf32>, vector<32x32xf32> -> vector<32x32xf32>
    %c0_3 = arith.constant 0 : index
    %c0_4 = arith.constant 0 : index
    %3 = vector.load %arg5[%c0_3, %c0_4] : memref<32x8xf32, #tpu.memory_space<vmem>>, vector<32x8xf32>
    %c0_5 = arith.constant 0 : index
    %c0_6 = arith.constant 0 : index
    %4 = vector.load %arg6[%c0_5, %c0_6] : memref<8x32xf32, #tpu.memory_space<vmem>>, vector<8x32xf32>
    %cst_7 = arith.constant dense<0.000000e+00> : vector<32x32xf32>
    %5 = tpu.matmul %3, %4, %cst_7 {dimension_numbers = #tpu.dot_dimension_numbers<[1], [0], [0], [1], [0, 0, 1, 1], [], []>} : vector<32x8xf32>, vector<8x32xf32>, vector<32x32xf32> -> vector<32x32xf32>
    %c0_8 = arith.constant 0 : index
    %c0_9 = arith.constant 0 : index
    %6 = vector.load %arg2[%c0_8, %c0_9] : memref<32x32xf32, #tpu.memory_space<vmem>>, vector<32x32xf32>
    %7 = arith.mulf %2, %5 : vector<32x32xf32>
    %cst_10 = arith.constant 5.000000e-01 : f32
    %8 = vector.broadcast %cst_10 : f32 to vector<32x32xf32>
    %9 = arith.mulf %8, %7 : vector<32x32xf32>
    %10 = arith.addf %6, %9 : vector<32x32xf32>
    %c0_11 = arith.constant 0 : index
    %c0_12 = arith.constant 0 : index
    %11 = vector.load %arg7[%c0_11, %c0_12] : memref<32x32xf32, #tpu.memory_space<vmem>>, vector<32x32xf32>
    tpu.vector_store %arg7[%c0_11, %c0_12], %10 {strides = array<i32>} : memref<32x32xf32, #tpu.memory_space<vmem>>, vector<32x32xf32>,
    return
  }
  func.func @transform_0(%arg0: i32, %arg1: i32) -> (i32, i32) {
    %c0_i32 = arith.constant 0 : i32
    return %arg0, %arg1 : i32, i32
  }
  func.func @transform_1(%arg0: i32, %arg1: i32) -> (i32, i32) {
    %c0_i32 = arith.constant 0 : i32
    %c0_i32_0 = arith.constant 0 : i32
    return %arg0, %c0_i32 : i32, i32
  }
  func.func @transform_2(%arg0: i32, %arg1: i32) -> (i32, i32) {
    %c0_i32 = arith.constant 0 : i32
    %c0_i32_0 = arith.constant 0 : i32
    return %c0_i32, %arg1 : i32, i32
  }
  func.func @transform_3(%arg0: i32, %arg1: i32) -> (i32, i32) {
    %c0_i32 = arith.constant 0 : i32
    %c0_i32_0 = arith.constant 0 : i32
    return %arg0, %c0_i32 : i32, i32
  }
  func.func @transform_4(%arg0: i32, %arg1: i32) -> (i32, i32) {
    %c0_i32 = arith.constant 0 : i32
    %c0_i32_0 = arith.constant 0 : i32
    return %c0_i32, %arg1 : i32, i32
  }
  func.func @transform_5(%arg0: i32, %arg1: i32) -> (i32, i32) {
    %c0_i32 = arith.constant 0 : i32
    return %arg0, %arg1 : i32, i32
  }
}

</mosaic_0001>

<bundles_post_ra>
// kernel: tpu_custom_call.1
= control target key start
LH: loop header
LB: loop body
LE: loop exit
PB: predicated region body
PF: predicated region fallthrough
CT: control target
= control target key end

     0   :  { %vm26_vm0 = vcmask 64512   ;;  %s282_s0 = inlined_call_operand.vmem [shape: f32[32,32], index: 0, kind: input, shape index: {}]   ;;  %s283_s1 = inlined_call_operand.vmem [shape: f32[32,8], index: 1, kind: input, shape index: {}]   ;;  %s284_s2 = inlined_call_operand.vmem [shape: f32[8,32], index: 2, kind: input, shape index: {}]   ;;  %s285_s3 = inlined_call_operand.vmem [shape: f32[32,8], index: 3, kind: input, shape index: {}]   ;;  %s286_s4 = inlined_call_operand.vmem [shape: f32[8,32], index: 4, kind: input, shape index: {}]   ;;  %s287_s5 = inlined_call_operand.hbm [shape: f32[32,32], index: 5, kind: output, shape index: {}]  }
   0x1   :  { %v25_v0 = vld [vmem:[%s284_s2] sm:$0xff]  ;;  %v23_v2 = vld [vmem:[%s283_s1 + $0x10] sm:$0xff] }
   0x2   :  { %v72_v1 = vld [vmem:[%s286_s4] sm:$0xff]  ;;  %161 = vmatpush.msra.mxu2 %v25_v0  ;;  %v70_v3 = vld [vmem:[%s285_s3 + $0x10] sm:$0xff]  ;;  %54 = vmatpush.msra.mxu0 %v25_v0 }
   0x3   :  { %162 = vmatpush.msra.mxu3 %v72_v1  ;;  %v21_v4 = vld [vmem:[%s283_s1] sm:$0xff]  ;;  %155 = vmatmul.msk.f32.vlgmr.msra.gmra.mxu2 %vm26_vm0, %v23_v2 }
   0x4   :  { %v68_v5 = vld [vmem:[%s285_s3] sm:$0xff]  ;;  %159 = vmatmul.msk.f32.vlgmr.msra.gmra.mxu3 %vm26_vm0, %v70_v3  ;;  %100 = vmatpush.msra.mxu1 %v72_v1 }
   0x5   :  { %10 = vsyncpa [#allocation3], 0  ;;  %153 = vmatmul.msk.f32.vlgmr.msra.gmra.mxu0 %vm26_vm0, %v21_v4  ;;  %157 = vmatmul.msk.f32.vlgmr.msra.gmra.mxu1 %vm26_vm0, %v68_v5  ;;  %v24_v6 = vld [vmem:[%s283_s1 + $0x18] sm:$0xff]  ;;  %v22_v8 = vld [vmem:[%s283_s1 + $0x8] sm:$0xff]  ;;  %vm130_vm1 = vcmask 261120   ;;  %s192_s15 = smov [#allocation2]  }
   0x6   :  { %v71_v7 = vld [vmem:[%s285_s3 + $0x18] sm:$0xff]  ;;  %v69_v9 = vld [vmem:[%s285_s3 + $0x8] sm:$0xff]  ;;  %v114_v13 = vld [vmem:[%s282_s0] sm:$0xff]  ;;  %s139_s16 = sshll.u32 %s192_s15, 4  ;;  %s141_s19 = sshll.u32 %s287_s5, 4  ;;  %s140_s16 = int_to_ptr.vmem [resolvable:$true] %s139_s16  ;;  %s142_s19 = int_to_ptr.hbm [resolvable:$true] %s141_s19 }
   0x7   :  { %v116_v19 = vld [vmem:[%s282_s0 + $0x10] sm:$0xff]  ;;  %v115_v25 = vld [vmem:[%s282_s0 + $0x8] sm:$0xff]  ;;  %v117_v31 = vld [vmem:[%s282_s0 + $0x18] sm:$0xff]  ;;  %s193_s22 = smov 128   ;;  %s194_s23 = smov 8  }
   0xb   :  { %156 = vmatmul.msk.f32.gmra.mxu2 %vm26_vm0, %v24_v6 }
   0xc   :  { %160 = vmatmul.msk.f32.gmra.mxu3 %vm26_vm0, %v71_v7 }
   0xd   :  { %154 = vmatmul.msk.f32.gmra.mxu0 %vm26_vm0, %v22_v8  ;;  %158 = vmatmul.msk.f32.gmra.mxu1 %vm26_vm0, %v69_v9 }
  0x82   :  { %v56_v10 = vpop.f32.mrf.mxu0  ;;  %v102_v11 = vpop.f32.mrf.mxu1 }
  0x83   :  { %v118_v12 = vmul.f32 %v102_v11, %v56_v10 }
  0x85   :  { %v122_v14 = vmul.f32 0.5, %v118_v12 }
  0x86   :  { %v62_v15 = vpop.f32.mrf.mxu2 }
  0x87   :  { %v108_v16 = vpop.f32.mrf.mxu3  ;;  %v126_v17 = vadd.f32 %v122_v14, %v114_v13 }
  0x88   :  { %v120_v18 = vmul.f32 %v108_v16, %v62_v15 }
  0x89   :  { %131 = vst.msk [vmem:[#allocation2] sm:$0xff] %vm130_vm1, %v126_v17 }
  0x8a   :  { %v124_v20 = vmul.f32 0.5, %v120_v18  ;;  %v59_v21 = vpop.f32.mrf.mxu0  ;;  %v105_v22 = vpop.f32.mrf.mxu1 }
  0x8b   :  { %v119_v24 = vmul.f32 %v105_v22, %v59_v21 }
  0x8c   :  { %v128_v23 = vadd.f32 %v124_v20, %v116_v19 }
  0x8d   :  { %v123_v26 = vmul.f32 0.5, %v119_v24 }
  0x8e   :  { %133 = vst.msk [vmem:[#allocation2 + $0x10] sm:$0xff] %vm130_vm1, %v128_v23  ;;  %v65_v27 = vpop.f32.mrf.mxu2 }
  0x8f   :  { %v111_v28 = vpop.f32.mrf.mxu3  ;;  %v127_v29 = vadd.f32 %v123_v26, %v115_v25 }
  0x90   :  { %v121_v30 = vmul.f32 %v111_v28, %v65_v27 }
  0x91   :  { %132 = vst.msk [vmem:[#allocation2 + $0x8] sm:$0xff] %vm130_vm1, %v127_v29 }
  0x92   :  { %v125_v32 = vmul.f32 0.5, %v121_v30 }
  0x94   :  { %v129_v33 = vadd.f32 %v125_v32, %v117_v31 }
  0x96   :  { %134 = vst.msk [vmem:[#allocation2 + $0x18] sm:$0xff] %vm130_vm1, %v129_v33 }
  0x97   :  { %147 = dma.vmem_to_hbm [thread:$0]  %s140_s16, 512, %s142_s19, [#allocation3], %s193_s22, %s193_s22, %s194_s23  }
  0x98   :  { %190 = dma.done.wait [#allocation3], 512  }
  0x99   :  { %191 = vsyncadd [#allocation3], 4294966784 }
  0x9a   :  { %152 = vsyncpa [#allocation3], 1 }

</bundles_post_ra>
